<compile_context>
chip_gen: v6e
topology: v6e:2x2x1
jax: 0.10.0
libtpu: 0.0.40
codegen_flags: <defaults>
</compile_context>

<pallas_src>
import functools

import jax
import jax.numpy as jnp
from jax.experimental import pallas as pl
from jax.experimental.pallas import tpu as pltpu


def _device_kind() -> str:
    try:
        return jax.devices()[0].device_kind.lower()
    except Exception:
        return ""


def _compute_dtype(dtype, kind: str):
    # Native bf16 VPU/EUP exists on v6e/v7x; v5e (and anything unknown) gets
    # the safe f32 path.  f16 / f32 / everything else -> f32 compute.
    if dtype == jnp.bfloat16 and (("v6" in kind) or ("v7" in kind)):
        return jnp.bfloat16
    return jnp.float32


def _swish_kernel(x_ref, o_ref, *, compute_dtype):
    x = x_ref[...]
    xc = x.astype(compute_dtype)               # no-op for f32-in / f32-compute
    # sigmoid(x) = 1 / (1 + exp(-x)):
    #   exp        -> EUP (bf16-native where available)
    #   reciprocal -> EUP approx op (f32 operand), no VALU divide sequence.
    denom = jnp.exp(-xc).astype(jnp.float32) + 1.0
    sig = pl.reciprocal(denom, approx=True)
    o_ref[...] = (x.astype(jnp.float32) * sig).astype(o_ref.dtype)


def _swish_2d(x2d: jax.Array, *, kind: str, target_block_bytes: int) -> jax.Array:
    """Run the streaming kernel over a lane-dense (rows, lanes) array."""
    rows, lanes = x2d.shape
    dtype = x2d.dtype
    itemsize = jnp.dtype(dtype).itemsize

    # --- generation-aware VMEM budget ----------------------------------------
    # 2(in) + 2(out) double-buffered blocks + headroom must fit the scoped
    # limit we request; stay well under physical VMEM (64 MiB on v7x).
    vmem_cap = (48 << 20) if "v7" in kind else (96 << 20)
    headroom = 8 << 20
    max_block_bytes = (vmem_cap - headroom) // 4
    block_bytes_target = min(int(target_block_bytes), max_block_bytes)

    # --- block sizing: byte-based so packed dtypes get the same DMA size -----
    target_rows = max(8, (block_bytes_target // (lanes * itemsize)) // 8 * 8)
    tile_rows = rows if rows <= target_rows else target_rows

    # --- v7x: make sure both TensorCores have work ----------------------------
    core_parallel = getattr(pltpu, "CORE_PARALLEL", None)
    want_core_parallel = ("v7" in kind) and (core_parallel is not None)
    if want_core_parallel and rows > 8 and pl.cdiv(rows, tile_rows) < 2:
        # Split a single-block case into two blocks (multiple-of-8 rows).
        tile_rows = max(8, ((rows + 1) // 2 + 7) // 8 * 8)

    grid_steps = pl.cdiv(rows, tile_rows)
    block_bytes = tile_rows * lanes * itemsize
    vmem_limit = min(int(4 * block_bytes + headroom), vmem_cap)

    kernel = functools.partial(
        _swish_kernel, compute_dtype=_compute_dtype(dtype, kind))

    def call(dim_sem):
        return pl.pallas_call(
            kernel,
            out_shape=jax.ShapeDtypeStruct((rows, lanes), dtype),
            grid_spec=pltpu.PrefetchScalarGridSpec(
                num_scalar_prefetch=0,
                grid=(grid_steps,),
                in_specs=[pl.BlockSpec((tile_rows, lanes), lambda i: (i, 0))],
                out_specs=pl.BlockSpec((tile_rows, lanes), lambda i: (i, 0)),
            ),
            compiler_params=pltpu.CompilerParams(
                dimension_semantics=dim_sem,
                vmem_limit_bytes=vmem_limit,
            ),
        )(x2d)

    if want_core_parallel and grid_steps >= 2:
        # Core-parallel shards the grid axis across both v7x TensorCores so
        # each streams its own half of HBM.  Fall back to plain "parallel" if
        # this generation / toolchain rejects the semantic.
        try:
            return call((core_parallel,))
        except Exception:
            return call(("parallel",))
    return call(("parallel",))


def swish(x: jax.Array, *, target_block_bytes: int = 8 << 20) -> jax.Array:
    """Elementwise swish; matches x * sigmoid(x) for any shape/dtype."""
    orig_shape = x.shape
    dtype = x.dtype
    n = x.size
    if n == 0:
        return x

    kind = _device_kind()

    # --- fast, copy-free path: widest lane-dense slab width that divides n ---
    for cand in (1024, 512, 256, 128):
        if n % cand == 0:
            x2d = x.reshape(n // cand, cand)
            out2d = _swish_2d(x2d, kind=kind,
                              target_block_bytes=target_block_bytes)
            return out2d.reshape(orig_shape)

    # --- ragged fallback (n % 128 != 0) ---------------------------------------
    # Run the lane-divisible bulk through the kernel unchanged and compute the
    # <128-element tail with plain jnp.  This removes the old full-array
    # pad + [:n] slice (2 extra HBM passes); one stitch pass remains.
    flat = x.reshape(-1)
    bulk = (n // 128) * 128
    if bulk == 0:
        # Fewer than 128 elements: not worth a kernel launch.
        xf = flat.astype(jnp.float32)
        return (xf * jax.nn.sigmoid(xf)).astype(dtype).reshape(orig_shape)

    lanes = 128
    for cand in (1024, 512, 256):
        if bulk % cand == 0:
            lanes = cand
            break
    out_bulk = _swish_2d(flat[:bulk].reshape(bulk // lanes, lanes), kind=kind,
                         target_block_bytes=target_block_bytes).reshape(-1)
    tail = flat[bulk:].astype(jnp.float32)
    out_tail = (tail * jax.nn.sigmoid(tail)).astype(dtype)
    return jnp.concatenate([out_bulk, out_tail]).reshape(orig_shape)


if __name__ == "__main__":
    key = jax.random.PRNGKey(0)
    # NCHW input, same convention as the PyTorch module.
    x = jax.random.normal(key, (2, 4, 16, 16), dtype=jnp.float32)

    y = swish(x)
    jax.block_until_ready(y)

    # Correctness vs. the reference formula.  approx reciprocal (EUP vrcp)
    # carries a ~1e-3-class relative error budget, hence the tolerances.
    y_ref = x * jax.nn.sigmoid(x)
    assert y.shape == x.shape and y.dtype == x.dtype
    assert jnp.allclose(y, y_ref, atol=5e-3, rtol=5e-3)

    # Also exercise the ragged (n % 128 != 0) fallback path.
    xr = jax.random.normal(jax.random.PRNGKey(0), (3, 5, 13), dtype=jnp.float32)
    yr = swish(xr)
    jax.block_until_ready(yr)
    assert jnp.allclose(yr, xr * jax.nn.sigmoid(xr), atol=5e-3, rtol=5e-3)

    print("KERNEL_OK")
</pallas_src>

<mosaic_0001>
module attributes {stable_mosaic.version = 11 : i64} {
  func.func @_swish_kernel(%arg0: i32, %arg1: memref<2x1024xf32, #tpu.memory_space<vmem>>, %arg2: memref<2x1024xf32, #tpu.memory_space<vmem>>) attributes {dimension_semantics = [#tpu.dimension_semantics<parallel>], iteration_bounds = array<i64: 1>, scalar_prefetch = 0 : i64, scratch_operands = 0 : i64, tpu.core_type = #tpu.core_type<tc>, window_params = [{transform_indices = @transform_0, window_bounds = array<i64: 2, 1024>}, {transform_indices = @transform_1, window_bounds = array<i64: 2, 1024>}]} {
    %c0 = arith.constant 0 : index
    %c0_0 = arith.constant 0 : index
    %0 = vector.load %arg1[%c0, %c0_0] : memref<2x1024xf32, #tpu.memory_space<vmem>>, vector<2x1024xf32>
    %cst = arith.constant 0.000000e+00 : f32
    %1 = vector.broadcast %cst : f32 to vector<2x1024xf32>
    %2 = arith.subf %1, %0 : vector<2x1024xf32>
    %3 = math.exp %2 : vector<2x1024xf32>
    %cst_1 = arith.constant 1.000000e+00 : f32
    %4 = vector.broadcast %cst_1 : f32 to vector<2x1024xf32>
    %5 = arith.addf %3, %4 : vector<2x1024xf32>
    %6 = tpu.reciprocal %5 {approx = true} : vector<2x1024xf32> -> vector<2x1024xf32>
    %7 = arith.mulf %0, %6 : vector<2x1024xf32>
    %c0_2 = arith.constant 0 : index
    %c0_3 = arith.constant 0 : index
    %8 = vector.load %arg2[%c0_2, %c0_3] : memref<2x1024xf32, #tpu.memory_space<vmem>>, vector<2x1024xf32>
    tpu.vector_store %arg2[%c0_2, %c0_3], %7 {strides = array<i32>} : memref<2x1024xf32, #tpu.memory_space<vmem>>, vector<2x1024xf32>,
    return
  }
  func.func @transform_0(%arg0: i32) -> (i32, i32) {
    %c0_i32 = arith.constant 0 : i32
    %c0_i32_0 = arith.constant 0 : i32
    return %arg0, %c0_i32 : i32, i32
  }
  func.func @transform_1(%arg0: i32) -> (i32, i32) {
    %c0_i32 = arith.constant 0 : i32
    %c0_i32_0 = arith.constant 0 : i32
    return %arg0, %c0_i32 : i32, i32
  }
}

</mosaic_0001>

<bundles_post_ra>
// kernel: tpu_custom_call.1
= control target key start
LH: loop header
LB: loop body
LE: loop exit
PB: predicated region body
PF: predicated region fallthrough
CT: control target
= control target key end

     0   :  { %6 = vsyncpa [#allocation3], 0  ;;  %s124_s0 = inlined_call_operand.hbm [shape: f32[2,1024], index: 0, kind: input, shape index: {}]   ;;  %s125_s1 = inlined_call_operand.hbm [shape: f32[2,1024], index: 1, kind: output, shape index: {}]  }
   0x1   :  { %7 = vsyncpa [#allocation4], 0  ;;  %s106_s6 = smov [#allocation2]  }
   0x2   :  { %s14_s7 = sshll.u32 %s106_s6, 4  ;;  %s15_s7 = int_to_ptr.vmem [resolvable:$true] %s14_s7 }
   0x3   :  { %s70_s8 = scalar_lea.vmem %s15_s7, 256  ;;  %p75_p1 = scmp.lt.s32.totalorder %s15_s7, %s15_s7 }
   0x4   :  { %p71_p0 = scmp.ne.s32.totalorder %s15_s7, %s70_s8  ;;  %p76_p2 = scmp.lt.s32.totalorder %s70_s8, %s70_s8 }
   0x6   :  { %p77_p3 = por %p76_p2, %p75_p1 }
   0x8   :  { %p78_p4 = pnand %p77_p3, %p71_p0 }
   0xa   :  { %81 = shalt.err (!%p78_p4)
}
   0xb   :  { %17 = dma.hbm_to_vmem [thread:$0]  %s124_s0, 256, %s15_s7, [#allocation3]  }
   0xc   :  { %102 = dma.done.wait [#allocation3], 256  }
   0xd   :  { %103 = vsyncadd [#allocation3], 4294967040  ;;  %v21_v0 = vld [vmem:[#allocation2] sm:$0xff]  ;;  %v22_v1 = vld [vmem:[#allocation2 + $0x8] sm:$0xff]  ;;  %s107_s11 = smov [#allocation5]  }
   0xe   :  { %v23_v2 = vsub.f32 0.0, %v21_v0  ;;  %v24_v3 = vsub.f32 0.0, %v22_v1  ;;  %s43_s12 = sshll.u32 %s107_s11, 4  ;;  %s44_s12 = int_to_ptr.vmem [resolvable:$true] %s43_s12 }
   0xf   :  { %s82_s0 = scalar_lea.vmem %s44_s12, 256  ;;  %p87_p6 = scmp.lt.s32.totalorder %s44_s12, %s44_s12 }
  0x10   :  { %v25_v4 = vmul.f32 1.442695, %v23_v2  ;;  %v27_v5 = vmul.f32 1.442695, %v24_v3  ;;  %p83_p5 = scmp.ne.s32.totalorder %s44_s12, %s82_s0  ;;  %p88_p7 = scmp.lt.s32.totalorder %s82_s0, %s82_s0 }
  0x12   :  { %54 = vpow2.f32 %v25_v4  ;;  %p89_p8 = por %p88_p7, %p87_p6 }
  0x13   :  { %56 = vpow2.f32 %v27_v5 }
  0x14   :  { %p90_p9 = pnand %p89_p8, %p83_p5 }
  0x1f   :  { %v55_v6 = vpop.eup %54 }
  0x20   :  { %v57_v7 = vpop.eup %56  ;;  %v29_v8 = vadd.f32 1.0, %v55_v6 }
  0x21   :  { %v30_v9 = vadd.f32 1.0, %v57_v7 }
  0x22   :  { %58 = vrcp.f32 %v29_v8 }
  0x23   :  { %60 = vrcp.f32 %v30_v9 }
  0x2f   :  { %v59_v10 = vpop.eup %58 }
  0x30   :  { %v61_v11 = vpop.eup %60  ;;  %v33_v12 = vmul.f32 %v59_v10, %v21_v0 }
  0x31   :  { %v34_v13 = vmul.f32 %v61_v11, %v22_v1 }
  0x32   :  { %35 = vst [vmem:[#allocation5] sm:$0xff] %v33_v12 }
  0x33   :  { %36 = vst [vmem:[#allocation5 + $0x8] sm:$0xff] %v34_v13 }
  0x34   :  { %93 = shalt.err (!%p90_p9)
}
  0x35   :  { %46 = dma.vmem_to_hbm [thread:$0]  %s44_s12, 256, %s125_s1, [#allocation4]  }
  0x36   :  { %104 = dma.done.wait [#allocation4], 256  }
  0x37   :  { %105 = vsyncadd [#allocation4], 4294967040 }
  0x38   :  { %50 = vsyncpa [#allocation3], 1 }
  0x39   :  { %51 = vsyncpa [#allocation4], 1 }

</bundles_post_ra>
